<compile_context>
chip_gen: v7x
topology: tpu7x:2x2x1
jax: 0.10.0
libtpu: 0.0.40
codegen_flags: <defaults>
</compile_context>

<pallas_src>
import math

import jax
import jax.numpy as jnp
from jax import lax
from jax.experimental import pallas as pl
from jax.experimental.pallas import tpu as pltpu


def make_pe_table(d_model, max_len=1 << 13, dtype=jnp.float32):
    """Sinusoidal table, identical to the PyTorch __init__ (robust to odd d_model)."""
    position = jnp.arange(max_len, dtype=jnp.float32)[:, None]            # (max_len, 1)
    div_term = jnp.exp(
        jnp.arange(0, d_model, 2, dtype=jnp.float32) * (-math.log(10000.0) / d_model)
    )                                                                     # (ceil(d/2),)
    angles = position * div_term                                          # (max_len, ceil(d/2))
    pe = jnp.zeros((max_len, d_model), dtype=jnp.float32)
    pe = pe.at[:, 0::2].set(jnp.sin(angles)[:, : (d_model + 1) // 2])
    pe = pe.at[:, 1::2].set(jnp.cos(angles)[:, : d_model // 2])
    return pe.astype(dtype)


def _make_gather_kernel(tl, g, d_model, n_stores, stores_per_iter):
    """Gather `tl` pe rows per grid step; 8*g rows per dense (8, g*d_model) store."""
    unit = 8 * g                                   # gathered pe rows per store
    n_iter = n_stores // stores_per_iter

    def kernel(idx_ref, pe_ref, out_ref):
        # idx_ref : SMEM (n_padded,) int32   (scalar prefetch)
        # pe_ref  : VMEM (max_len, d_model)  (resident table)
        # out_ref : VMEM (tl // g, g * d_model) output block (sublane+lane dense)
        base = pl.program_id(0) * tl               # first gathered row of this tile

        def emit_store(s):
            # s: store index within this tile (Python int or traced int32).
            row0 = base + s * unit
            sub_rows = []
            for si in range(8):
                parts = []
                for gi in range(g):
                    r = idx_ref[row0 + si * g + gi]            # scalar index (SMEM)
                    parts.append(pe_ref[pl.ds(r, 1), :])       # (1, d_model) row
                # Lane-concat g gathered rows -> (1, g*d_model)  (XLU slot).
                sub_rows.append(parts[0] if g == 1 else jnp.concatenate(parts, axis=1))
            tile = jnp.concatenate(sub_rows, axis=0)           # (8, g*d_model)
            off = s * 8
            if not isinstance(off, int):
                off = pl.multiple_of(off, 8)
            out_ref[pl.ds(off, 8), :] = tile                   # one dense store

        if n_iter == 1:
            for u in range(stores_per_iter):                   # fully static unroll
                emit_store(u)
        else:
            def body(it, carry):
                for u in range(stores_per_iter):               # static partial unroll
                    emit_store(it * stores_per_iter + u)
                return carry
            lax.fori_loop(0, n_iter, body, 0)

    return kernel


def _pick_tile(n_rows, unit, target_rows):
    """Rows per grid step: a multiple of `unit`, near `target_rows`; avoid padding
    (and the post-call slice it forces) when a good divisor of n_rows exists."""
    target = max(unit, (target_rows // unit) * unit)
    if n_rows % unit == 0:
        if n_rows <= target:
            return n_rows
        best, d = unit, target
        while d >= unit:                     # largest multiple-of-unit divisor <= target
            if n_rows % d == 0:
                best = d
                break
            d -= unit
        if best >= min(256, n_rows):
            return best
    return min(target, ((n_rows + unit - 1) // unit) * unit)


def _vmem_capacity_bytes():
    try:
        return int(pltpu.get_tpu_info().vmem_capacity_bytes)   # generation-aware
    except Exception:
        return 64 << 20                                         # v7x per-TC, conservative


def positional_encoding(idx, pe, *, target_rows_per_step=1024):
    """out[b, l, :] = pe[idx[b, l], :].

    Note: out-of-range indices are clamped to [0, max_len) as a safety net
    (VMEM reads are unchecked); PyTorch would raise instead.
    """
    B, L = idx.shape
    max_len, d_model = pe.shape
    n = B * L

    # Lane packing: g gathered rows per lane-dense (128-wide) output row.
    g = 128 // d_model if (d_model < 128 and 128 % d_model == 0) else 1
    unit = 8 * g                                   # gathered rows per dense store

    idx_flat = jnp.clip(idx.astype(jnp.int32), 0, max_len - 1).reshape(-1)

    tl = _pick_tile(n, unit, target_rows_per_step)
    n_padded = ((n + tl - 1) // tl) * tl
    if n_padded != n:
        idx_flat = jnp.pad(idx_flat, (0, n_padded - n))        # pad with valid index 0
    # TODO(synk): for very large B*L (~>200K indices) the flat SMEM scalar-prefetch
    # array exceeds SMEM; switch idx to per-tile SMEM-blocked in_specs instead.

    n_stores = tl // unit
    if n_stores <= 8:
        spi = n_stores                                          # fully static tile
    else:
        spi = next(d for d in (8, 4, 2, 1) if n_stores % d == 0)

    itemsize = jnp.dtype(pe.dtype).itemsize
    table_bytes = max_len * d_model * itemsize
    out_tile_bytes = tl * d_model * itemsize
    vmem_cap = _vmem_capacity_bytes()

    # pe table: VMEM-resident, constant block index -> fetched once.  Single-buffer
    # it when the second copy would meaningfully eat into the VMEM budget.
    pe_index_map = lambda t, idx_ref: (0, 0)
    pe_spec = pl.BlockSpec((max_len, d_model), pe_index_map)
    table_bufs = 2
    if 2 * table_bytes > vmem_cap // 4:
        try:
            pe_spec = pl.BlockSpec((max_len, d_model), pe_index_map,
                                   pipeline_mode=pl.Buffered(1))
            table_bufs = 1
        except Exception:
            pass                                                # keep default buffering

    grid_spec = pltpu.PrefetchScalarGridSpec(
        num_scalar_prefetch=1,                                  # idx -> SMEM
        grid=(n_padded // tl,),
        in_specs=[pe_spec],
        # Output block: sublane-dense (tl//g % 8 == 0) and lane-dense
        # (g*d_model == 128 when d_model < 128, else the full d_model).
        out_specs=pl.BlockSpec((tl // g, g * d_model), lambda t, idx_ref: (t, 0)),
    )

    # Generation-aware VMEM budget (v5e/v6e: 128 MiB; v7x: 64 MiB per TensorCore).
    vmem_needed = table_bufs * table_bytes + 2 * out_tile_bytes + (2 << 20)
    if vmem_needed > vmem_cap - (4 << 20):
        # TODO(synk): fall back to a manual double-buffered HBM DMA gather
        # (pe in memory_space=pl.ANY) instead of failing for huge tables.
        raise NotImplementedError(
            f"pe table ({table_bytes >> 20} MiB) does not fit the VMEM budget "
            f"({vmem_cap >> 20} MiB); HBM-gather fallback not implemented."
        )
    vmem_limit = int(min(max(vmem_needed, 32 << 20), vmem_cap - (4 << 20)))

    out_packed = pl.pallas_call(
        _make_gather_kernel(tl, g, d_model, n_stores, spi),
        out_shape=jax.ShapeDtypeStruct((n_padded // g, g * d_model), pe.dtype),
        grid_spec=grid_spec,
        compiler_params=pltpu.CompilerParams(
            dimension_semantics=("parallel",),
            vmem_limit_bytes=vmem_limit,
        ),
    )(idx_flat, pe)

    if n_padded == n:
        return out_packed.reshape(B, L, d_model)                # contiguous, no copy
    # Padded case: undo lane packing, drop pad rows (one extra HBM copy).
    return out_packed.reshape(n_padded, d_model)[:n].reshape(B, L, d_model)


if __name__ == "__main__":
    d_model = 32
    max_len = 1 << 13
    pe = make_pe_table(d_model, max_len)

    # Small shapes implied by forward(): idx (B, L) -> out (B, L, d_model).
    B, L = 2, 8
    idx = jax.random.randint(jax.random.PRNGKey(0), (B, L), 0, max_len, dtype=jnp.int32)
    out = jax.block_until_ready(positional_encoding(idx, pe))
    assert out.shape == (B, L, d_model) and out.dtype == pe.dtype
    assert jnp.allclose(out, pe[idx]), "mismatch vs reference gather (small case)"

    # Second check: exercises the multi-step grid / rolled inner-loop path (no padding).
    B2, L2 = 3, 352
    idx2 = jax.random.randint(jax.random.PRNGKey(1), (B2, L2), 0, max_len, dtype=jnp.int32)
    out2 = jax.block_until_ready(positional_encoding(idx2, pe))
    assert out2.shape == (B2, L2, d_model)
    assert jnp.allclose(out2, pe[idx2]), "mismatch vs reference gather (multi-step case)"

    print("KERNEL_OK")
</pallas_src>

<mosaic_0001>
module attributes {stable_mosaic.version = 11 : i64} {
  func.func @kernel(%arg0: i32, %arg1: memref<32xi32, #tpu.memory_space<smem>>, %arg2: memref<8192x32xf32, #tpu.memory_space<vmem>>, %arg3: memref<8x128xf32, #tpu.memory_space<vmem>>) attributes {dimension_semantics = [#tpu.dimension_semantics<parallel>], iteration_bounds = array<i64: 1>, scalar_prefetch = 1 : i64, scratch_operands = 0 : i64, tpu.core_type = #tpu.core_type<tc>, window_params = [{pipeline_mode = #tpu.pipeline_mode<synchronous>, transform_indices = @transform_0, window_bounds = array<i64: 8192, 32>}, {transform_indices = @transform_1, window_bounds = array<i64: 8, 128>}]} {
    %c32_i32 = arith.constant 32 : i32
    %0 = arith.muli %arg0, %c32_i32 : i32
    %c0_i32 = arith.constant 0 : i32
    %1 = arith.addi %0, %c0_i32 : i32
    %c0_i32_0 = arith.constant 0 : i32
    %2 = arith.addi %1, %c0_i32_0 : i32
    %c0_i32_1 = arith.constant 0 : i32
    %3 = arith.addi %2, %c0_i32_1 : i32
    %4 = arith.index_cast %3 : i32 to index
    %5 = memref.load %arg1[%4] : memref<32xi32, #tpu.memory_space<smem>>
    %6 = arith.index_cast %5 : i32 to index
    %c0 = arith.constant 0 : index
    %7 = vector.load %arg2[%6, %c0] : memref<8192x32xf32, #tpu.memory_space<vmem>>, vector<1x32xf32>
    %c0_i32_2 = arith.constant 0 : i32
    %8 = arith.addi %1, %c0_i32_2 : i32
    %c1_i32 = arith.constant 1 : i32
    %9 = arith.addi %8, %c1_i32 : i32
    %10 = arith.index_cast %9 : i32 to index
    %11 = memref.load %arg1[%10] : memref<32xi32, #tpu.memory_space<smem>>
    %12 = arith.index_cast %11 : i32 to index
    %c0_3 = arith.constant 0 : index
    %13 = vector.load %arg2[%12, %c0_3] : memref<8192x32xf32, #tpu.memory_space<vmem>>, vector<1x32xf32>
    %c0_i32_4 = arith.constant 0 : i32
    %14 = arith.addi %1, %c0_i32_4 : i32
    %c2_i32 = arith.constant 2 : i32
    %15 = arith.addi %14, %c2_i32 : i32
    %16 = arith.index_cast %15 : i32 to index
    %17 = memref.load %arg1[%16] : memref<32xi32, #tpu.memory_space<smem>>
    %18 = arith.index_cast %17 : i32 to index
    %c0_5 = arith.constant 0 : index
    %19 = vector.load %arg2[%18, %c0_5] : memref<8192x32xf32, #tpu.memory_space<vmem>>, vector<1x32xf32>
    %c0_i32_6 = arith.constant 0 : i32
    %20 = arith.addi %1, %c0_i32_6 : i32
    %c3_i32 = arith.constant 3 : i32
    %21 = arith.addi %20, %c3_i32 : i32
    %22 = arith.index_cast %21 : i32 to index
    %23 = memref.load %arg1[%22] : memref<32xi32, #tpu.memory_space<smem>>
    %24 = arith.index_cast %23 : i32 to index
    %c0_7 = arith.constant 0 : index
    %25 = vector.load %arg2[%24, %c0_7] : memref<8192x32xf32, #tpu.memory_space<vmem>>, vector<1x32xf32>
    %26 = tpu.concatenate %7, %13, %19, %25 in 1 : vector<1x32xf32>, vector<1x32xf32>, vector<1x32xf32>, vector<1x32xf32> -> vector<1x128xf32>
    %c4_i32 = arith.constant 4 : i32
    %27 = arith.addi %1, %c4_i32 : i32
    %c0_i32_8 = arith.constant 0 : i32
    %28 = arith.addi %27, %c0_i32_8 : i32
    %29 = arith.index_cast %28 : i32 to index
    %30 = memref.load %arg1[%29] : memref<32xi32, #tpu.memory_space<smem>>
    %31 = arith.index_cast %30 : i32 to index
    %c0_9 = arith.constant 0 : index
    %32 = vector.load %arg2[%31, %c0_9] : memref<8192x32xf32, #tpu.memory_space<vmem>>, vector<1x32xf32>
    %c4_i32_10 = arith.constant 4 : i32
    %33 = arith.addi %1, %c4_i32_10 : i32
    %c1_i32_11 = arith.constant 1 : i32
    %34 = arith.addi %33, %c1_i32_11 : i32
    %35 = arith.index_cast %34 : i32 to index
    %36 = memref.load %arg1[%35] : memref<32xi32, #tpu.memory_space<smem>>
    %37 = arith.index_cast %36 : i32 to index
    %c0_12 = arith.constant 0 : index
    %38 = vector.load %arg2[%37, %c0_12] : memref<8192x32xf32, #tpu.memory_space<vmem>>, vector<1x32xf32>
    %c4_i32_13 = arith.constant 4 : i32
    %39 = arith.addi %1, %c4_i32_13 : i32
    %c2_i32_14 = arith.constant 2 : i32
    %40 = arith.addi %39, %c2_i32_14 : i32
    %41 = arith.index_cast %40 : i32 to index
    %42 = memref.load %arg1[%41] : memref<32xi32, #tpu.memory_space<smem>>
    %43 = arith.index_cast %42 : i32 to index
    %c0_15 = arith.constant 0 : index
    %44 = vector.load %arg2[%43, %c0_15] : memref<8192x32xf32, #tpu.memory_space<vmem>>, vector<1x32xf32>
    %c4_i32_16 = arith.constant 4 : i32
    %45 = arith.addi %1, %c4_i32_16 : i32
    %c3_i32_17 = arith.constant 3 : i32
    %46 = arith.addi %45, %c3_i32_17 : i32
    %47 = arith.index_cast %46 : i32 to index
    %48 = memref.load %arg1[%47] : memref<32xi32, #tpu.memory_space<smem>>
    %49 = arith.index_cast %48 : i32 to index
    %c0_18 = arith.constant 0 : index
    %50 = vector.load %arg2[%49, %c0_18] : memref<8192x32xf32, #tpu.memory_space<vmem>>, vector<1x32xf32>
    %51 = tpu.concatenate %32, %38, %44, %50 in 1 : vector<1x32xf32>, vector<1x32xf32>, vector<1x32xf32>, vector<1x32xf32> -> vector<1x128xf32>
    %c8_i32 = arith.constant 8 : i32
    %52 = arith.addi %1, %c8_i32 : i32
    %c0_i32_19 = arith.constant 0 : i32
    %53 = arith.addi %52, %c0_i32_19 : i32
    %54 = arith.index_cast %53 : i32 to index
    %55 = memref.load %arg1[%54] : memref<32xi32, #tpu.memory_space<smem>>
    %56 = arith.index_cast %55 : i32 to index
    %c0_20 = arith.constant 0 : index
    %57 = vector.load %arg2[%56, %c0_20] : memref<8192x32xf32, #tpu.memory_space<vmem>>, vector<1x32xf32>
    %c8_i32_21 = arith.constant 8 : i32
    %58 = arith.addi %1, %c8_i32_21 : i32
    %c1_i32_22 = arith.constant 1 : i32
    %59 = arith.addi %58, %c1_i32_22 : i32
    %60 = arith.index_cast %59 : i32 to index
    %61 = memref.load %arg1[%60] : memref<32xi32, #tpu.memory_space<smem>>
    %62 = arith.index_cast %61 : i32 to index
    %c0_23 = arith.constant 0 : index
    %63 = vector.load %arg2[%62, %c0_23] : memref<8192x32xf32, #tpu.memory_space<vmem>>, vector<1x32xf32>
    %c8_i32_24 = arith.constant 8 : i32
    %64 = arith.addi %1, %c8_i32_24 : i32
    %c2_i32_25 = arith.constant 2 : i32
    %65 = arith.addi %64, %c2_i32_25 : i32
    %66 = arith.index_cast %65 : i32 to index
    %67 = memref.load %arg1[%66] : memref<32xi32, #tpu.memory_space<smem>>
    %68 = arith.index_cast %67 : i32 to index
    %c0_26 = arith.constant 0 : index
    %69 = vector.load %arg2[%68, %c0_26] : memref<8192x32xf32, #tpu.memory_space<vmem>>, vector<1x32xf32>
    %c8_i32_27 = arith.constant 8 : i32
    %70 = arith.addi %1, %c8_i32_27 : i32
    %c3_i32_28 = arith.constant 3 : i32
    %71 = arith.addi %70, %c3_i32_28 : i32
    %72 = arith.index_cast %71 : i32 to index
    %73 = memref.load %arg1[%72] : memref<32xi32, #tpu.memory_space<smem>>
    %74 = arith.index_cast %73 : i32 to index
    %c0_29 = arith.constant 0 : index
    %75 = vector.load %arg2[%74, %c0_29] : memref<8192x32xf32, #tpu.memory_space<vmem>>, vector<1x32xf32>
    %76 = tpu.concatenate %57, %63, %69, %75 in 1 : vector<1x32xf32>, vector<1x32xf32>, vector<1x32xf32>, vector<1x32xf32> -> vector<1x128xf32>
    %c12_i32 = arith.constant 12 : i32
    %77 = arith.addi %1, %c12_i32 : i32
    %c0_i32_30 = arith.constant 0 : i32
    %78 = arith.addi %77, %c0_i32_30 : i32
    %79 = arith.index_cast %78 : i32 to index
    %80 = memref.load %arg1[%79] : memref<32xi32, #tpu.memory_space<smem>>
    %81 = arith.index_cast %80 : i32 to index
    %c0_31 = arith.constant 0 : index
    %82 = vector.load %arg2[%81, %c0_31] : memref<8192x32xf32, #tpu.memory_space<vmem>>, vector<1x32xf32>
    %c12_i32_32 = arith.constant 12 : i32
    %83 = arith.addi %1, %c12_i32_32 : i32
    %c1_i32_33 = arith.constant 1 : i32
    %84 = arith.addi %83, %c1_i32_33 : i32
    %85 = arith.index_cast %84 : i32 to index
    %86 = memref.load %arg1[%85] : memref<32xi32, #tpu.memory_space<smem>>
    %87 = arith.index_cast %86 : i32 to index
    %c0_34 = arith.constant 0 : index
    %88 = vector.load %arg2[%87, %c0_34] : memref<8192x32xf32, #tpu.memory_space<vmem>>, vector<1x32xf32>
    %c12_i32_35 = arith.constant 12 : i32
    %89 = arith.addi %1, %c12_i32_35 : i32
    %c2_i32_36 = arith.constant 2 : i32
    %90 = arith.addi %89, %c2_i32_36 : i32
    %91 = arith.index_cast %90 : i32 to index
    %92 = memref.load %arg1[%91] : memref<32xi32, #tpu.memory_space<smem>>
    %93 = arith.index_cast %92 : i32 to index
    %c0_37 = arith.constant 0 : index
    %94 = vector.load %arg2[%93, %c0_37] : memref<8192x32xf32, #tpu.memory_space<vmem>>, vector<1x32xf32>
    %c12_i32_38 = arith.constant 12 : i32
    %95 = arith.addi %1, %c12_i32_38 : i32
    %c3_i32_39 = arith.constant 3 : i32
    %96 = arith.addi %95, %c3_i32_39 : i32
    %97 = arith.index_cast %96 : i32 to index
    %98 = memref.load %arg1[%97] : memref<32xi32, #tpu.memory_space<smem>>
    %99 = arith.index_cast %98 : i32 to index
    %c0_40 = arith.constant 0 : index
    %100 = vector.load %arg2[%99, %c0_40] : memref<8192x32xf32, #tpu.memory_space<vmem>>, vector<1x32xf32>
    %101 = tpu.concatenate %82, %88, %94, %100 in 1 : vector<1x32xf32>, vector<1x32xf32>, vector<1x32xf32>, vector<1x32xf32> -> vector<1x128xf32>
    %c16_i32 = arith.constant 16 : i32
    %102 = arith.addi %1, %c16_i32 : i32
    %c0_i32_41 = arith.constant 0 : i32
    %103 = arith.addi %102, %c0_i32_41 : i32
    %104 = arith.index_cast %103 : i32 to index
    %105 = memref.load %arg1[%104] : memref<32xi32, #tpu.memory_space<smem>>
    %106 = arith.index_cast %105 : i32 to index
    %c0_42 = arith.constant 0 : index
    %107 = vector.load %arg2[%106, %c0_42] : memref<8192x32xf32, #tpu.memory_space<vmem>>, vector<1x32xf32>
    %c16_i32_43 = arith.constant 16 : i32
    %108 = arith.addi %1, %c16_i32_43 : i32
    %c1_i32_44 = arith.constant 1 : i32
    %109 = arith.addi %108, %c1_i32_44 : i32
    %110 = arith.index_cast %109 : i32 to index
    %111 = memref.load %arg1[%110] : memref<32xi32, #tpu.memory_space<smem>>
    %112 = arith.index_cast %111 : i32 to index
    %c0_45 = arith.constant 0 : index
    %113 = vector.load %arg2[%112, %c0_45] : memref<8192x32xf32, #tpu.memory_space<vmem>>, vector<1x32xf32>
    %c16_i32_46 = arith.constant 16 : i32
    %114 = arith.addi %1, %c16_i32_46 : i32
    %c2_i32_47 = arith.constant 2 : i32
    %115 = arith.addi %114, %c2_i32_47 : i32
    %116 = arith.index_cast %115 : i32 to index
    %117 = memref.load %arg1[%116] : memref<32xi32, #tpu.memory_space<smem>>
    %118 = arith.index_cast %117 : i32 to index
    %c0_48 = arith.constant 0 : index
    %119 = vector.load %arg2[%118, %c0_48] : memref<8192x32xf32, #tpu.memory_space<vmem>>, vector<1x32xf32>
    %c16_i32_49 = arith.constant 16 : i32
    %120 = arith.addi %1, %c16_i32_49 : i32
    %c3_i32_50 = arith.constant 3 : i32
    %121 = arith.addi %120, %c3_i32_50 : i32
    %122 = arith.index_cast %121 : i32 to index
    %123 = memref.load %arg1[%122] : memref<32xi32, #tpu.memory_space<smem>>
    %124 = arith.index_cast %123 : i32 to index
    %c0_51 = arith.constant 0 : index
    %125 = vector.load %arg2[%124, %c0_51] : memref<8192x32xf32, #tpu.memory_space<vmem>>, vector<1x32xf32>
    %126 = tpu.concatenate %107, %113, %119, %125 in 1 : vector<1x32xf32>, vector<1x32xf32>, vector<1x32xf32>, vector<1x32xf32> -> vector<1x128xf32>
    %c20_i32 = arith.constant 20 : i32
    %127 = arith.addi %1, %c20_i32 : i32
    %c0_i32_52 = arith.constant 0 : i32
    %128 = arith.addi %127, %c0_i32_52 : i32
    %129 = arith.index_cast %128 : i32 to index
    %130 = memref.load %arg1[%129] : memref<32xi32, #tpu.memory_space<smem>>
    %131 = arith.index_cast %130 : i32 to index
    %c0_53 = arith.constant 0 : index
    %132 = vector.load %arg2[%131, %c0_53] : memref<8192x32xf32, #tpu.memory_space<vmem>>, vector<1x32xf32>
    %c20_i32_54 = arith.constant 20 : i32
    %133 = arith.addi %1, %c20_i32_54 : i32
    %c1_i32_55 = arith.constant 1 : i32
    %134 = arith.addi %133, %c1_i32_55 : i32
    %135 = arith.index_cast %134 : i32 to index
    %136 = memref.load %arg1[%135] : memref<32xi32, #tpu.memory_space<smem>>
    %137 = arith.index_cast %136 : i32 to index
    %c0_56 = arith.constant 0 : index
    %138 = vector.load %arg2[%137, %c0_56] : memref<8192x32xf32, #tpu.memory_space<vmem>>, vector<1x32xf32>
    %c20_i32_57 = arith.constant 20 : i32
    %139 = arith.addi %1, %c20_i32_57 : i32
    %c2_i32_58 = arith.constant 2 : i32
    %140 = arith.addi %139, %c2_i32_58 : i32
    %141 = arith.index_cast %140 : i32 to index
    %142 = memref.load %arg1[%141] : memref<32xi32, #tpu.memory_space<smem>>
    %143 = arith.index_cast %142 : i32 to index
    %c0_59 = arith.constant 0 : index
    %144 = vector.load %arg2[%143, %c0_59] : memref<8192x32xf32, #tpu.memory_space<vmem>>, vector<1x32xf32>
    %c20_i32_60 = arith.constant 20 : i32
    %145 = arith.addi %1, %c20_i32_60 : i32
    %c3_i32_61 = arith.constant 3 : i32
    %146 = arith.addi %145, %c3_i32_61 : i32
    %147 = arith.index_cast %146 : i32 to index
    %148 = memref.load %arg1[%147] : memref<32xi32, #tpu.memory_space<smem>>
    %149 = arith.index_cast %148 : i32 to index
    %c0_62 = arith.constant 0 : index
    %150 = vector.load %arg2[%149, %c0_62] : memref<8192x32xf32, #tpu.memory_space<vmem>>, vector<1x32xf32>
    %151 = tpu.concatenate %132, %138, %144, %150 in 1 : vector<1x32xf32>, vector<1x32xf32>, vector<1x32xf32>, vector<1x32xf32> -> vector<1x128xf32>
    %c24_i32 = arith.constant 24 : i32
    %152 = arith.addi %1, %c24_i32 : i32
    %c0_i32_63 = arith.constant 0 : i32
    %153 = arith.addi %152, %c0_i32_63 : i32
    %154 = arith.index_cast %153 : i32 to index
    %155 = memref.load %arg1[%154] : memref<32xi32, #tpu.memory_space<smem>>
    %156 = arith.index_cast %155 : i32 to index
    %c0_64 = arith.constant 0 : index
    %157 = vector.load %arg2[%156, %c0_64] : memref<8192x32xf32, #tpu.memory_space<vmem>>, vector<1x32xf32>
    %c24_i32_65 = arith.constant 24 : i32
    %158 = arith.addi %1, %c24_i32_65 : i32
    %c1_i32_66 = arith.constant 1 : i32
    %159 = arith.addi %158, %c1_i32_66 : i32
    %160 = arith.index_cast %159 : i32 to index
    %161 = memref.load %arg1[%160] : memref<32xi32, #tpu.memory_space<smem>>
    %162 = arith.index_cast %161 : i32 to index
    %c0_67 = arith.constant 0 : index
    %163 = vector.load %arg2[%162, %c0_67] : memref<8192x32xf32, #tpu.memory_space<vmem>>, vector<1x32xf32>
    %c24_i32_68 = arith.constant 24 : i32
    %164 = arith.addi %1, %c24_i32_68 : i32
    %c2_i32_69 = arith.constant 2 : i32
    %165 = arith.addi %164, %c2_i32_69 : i32
    %166 = arith.index_cast %165 : i32 to index
    %167 = memref.load %arg1[%166] : memref<32xi32, #tpu.memory_space<smem>>
    %168 = arith.index_cast %167 : i32 to index
    %c0_70 = arith.constant 0 : index
    %169 = vector.load %arg2[%168, %c0_70] : memref<8192x32xf32, #tpu.memory_space<vmem>>, vector<1x32xf32>
    %c24_i32_71 = arith.constant 24 : i32
    %170 = arith.addi %1, %c24_i32_71 : i32
    %c3_i32_72 = arith.constant 3 : i32
    %171 = arith.addi %170, %c3_i32_72 : i32
    %172 = arith.index_cast %171 : i32 to index
    %173 = memref.load %arg1[%172] : memref<32xi32, #tpu.memory_space<smem>>
    %174 = arith.index_cast %173 : i32 to index
    %c0_73 = arith.constant 0 : index
    %175 = vector.load %arg2[%174, %c0_73] : memref<8192x32xf32, #tpu.memory_space<vmem>>, vector<1x32xf32>
    %176 = tpu.concatenate %157, %163, %169, %175 in 1 : vector<1x32xf32>, vector<1x32xf32>, vector<1x32xf32>, vector<1x32xf32> -> vector<1x128xf32>
    %c28_i32 = arith.constant 28 : i32
    %177 = arith.addi %1, %c28_i32 : i32
    %c0_i32_74 = arith.constant 0 : i32
    %178 = arith.addi %177, %c0_i32_74 : i32
    %179 = arith.index_cast %178 : i32 to index
    %180 = memref.load %arg1[%179] : memref<32xi32, #tpu.memory_space<smem>>
    %181 = arith.index_cast %180 : i32 to index
    %c0_75 = arith.constant 0 : index
    %182 = vector.load %arg2[%181, %c0_75] : memref<8192x32xf32, #tpu.memory_space<vmem>>, vector<1x32xf32>
    %c28_i32_76 = arith.constant 28 : i32
    %183 = arith.addi %1, %c28_i32_76 : i32
    %c1_i32_77 = arith.constant 1 : i32
    %184 = arith.addi %183, %c1_i32_77 : i32
    %185 = arith.index_cast %184 : i32 to index
    %186 = memref.load %arg1[%185] : memref<32xi32, #tpu.memory_space<smem>>
    %187 = arith.index_cast %186 : i32 to index
    %c0_78 = arith.constant 0 : index
    %188 = vector.load %arg2[%187, %c0_78] : memref<8192x32xf32, #tpu.memory_space<vmem>>, vector<1x32xf32>
    %c28_i32_79 = arith.constant 28 : i32
    %189 = arith.addi %1, %c28_i32_79 : i32
    %c2_i32_80 = arith.constant 2 : i32
    %190 = arith.addi %189, %c2_i32_80 : i32
    %191 = arith.index_cast %190 : i32 to index
    %192 = memref.load %arg1[%191] : memref<32xi32, #tpu.memory_space<smem>>
    %193 = arith.index_cast %192 : i32 to index
    %c0_81 = arith.constant 0 : index
    %194 = vector.load %arg2[%193, %c0_81] : memref<8192x32xf32, #tpu.memory_space<vmem>>, vector<1x32xf32>
    %c28_i32_82 = arith.constant 28 : i32
    %195 = arith.addi %1, %c28_i32_82 : i32
    %c3_i32_83 = arith.constant 3 : i32
    %196 = arith.addi %195, %c3_i32_83 : i32
    %197 = arith.index_cast %196 : i32 to index
    %198 = memref.load %arg1[%197] : memref<32xi32, #tpu.memory_space<smem>>
    %199 = arith.index_cast %198 : i32 to index
    %c0_84 = arith.constant 0 : index
    %200 = vector.load %arg2[%199, %c0_84] : memref<8192x32xf32, #tpu.memory_space<vmem>>, vector<1x32xf32>
    %201 = tpu.concatenate %182, %188, %194, %200 in 1 : vector<1x32xf32>, vector<1x32xf32>, vector<1x32xf32>, vector<1x32xf32> -> vector<1x128xf32>
    %202 = tpu.concatenate %26, %51, %76, %101, %126, %151, %176, %201 in 0 : vector<1x128xf32>, vector<1x128xf32>, vector<1x128xf32>, vector<1x128xf32>, vector<1x128xf32>, vector<1x128xf32>, vector<1x128xf32>, vector<1x128xf32> -> vector<8x128xf32>
    %c0_85 = arith.constant 0 : index
    %c0_86 = arith.constant 0 : index
    %203 = vector.load %arg3[%c0_85, %c0_86] : memref<8x128xf32, #tpu.memory_space<vmem>>, vector<8x128xf32>
    tpu.vector_store %arg3[%c0_85, %c0_86], %202 {strides = array<i32>} : memref<8x128xf32, #tpu.memory_space<vmem>>, vector<8x128xf32>,
    return
  }
  func.func @transform_0(%arg0: i32, %arg1: memref<32xi32, #tpu.memory_space<smem>>) -> (i32, i32) {
    %c0_i32 = arith.constant 0 : i32
    %c0_i32_0 = arith.constant 0 : i32
    %c0_i32_1 = arith.constant 0 : i32
    return %c0_i32, %c0_i32_0 : i32, i32
  }
  func.func @transform_1(%arg0: i32, %arg1: memref<32xi32, #tpu.memory_space<smem>>) -> (i32, i32) {
    %c0_i32 = arith.constant 0 : i32
    %c0_i32_0 = arith.constant 0 : i32
    return %arg0, %c0_i32 : i32, i32
  }
}

</mosaic_0001>

<bundles_post_ra>
// kernel: tpu_custom_call.1
= control target key start
LH: loop header
LB: loop body
LE: loop exit
PB: predicated region body
PF: predicated region fallthrough
CT: control target
= control target key end

     0   :  { %s609_s0 = inlined_call_operand.vmem [shape: s32[32], index: 0, kind: input, shape index: {}]   ;;  %s610_s1 = inlined_call_operand.vmem [shape: f32[8192,32], index: 1, kind: input, shape index: {}]   ;;  %s611_s2 = inlined_call_operand.hbm [shape: f32[8,128], index: 2, kind: output, shape index: {}]  }
   0x1   :  { %s7_s11 = sshll.u32 %s609_s0, 4  ;;  %s8_s11 = int_to_ptr.vmem [resolvable:$true] %s7_s11 }
   0x2   :  { %s385_s12 = scalar_lea.vmem %s8_s11, 16  ;;  %p390_p1 = scmp.lt.s32.totalorder %s8_s11, %s8_s11 }
   0x3   :  { %p386_p0 = scmp.ne.s32.totalorder %s8_s11, %s385_s12  ;;  %p391_p2 = scmp.lt.s32.totalorder %s385_s12, %s385_s12 }
   0x5   :  { %p392_p3 = por %p391_p2, %p390_p1 }
   0x7   :  { %p393_p4 = pnand %p392_p3, %p386_p0 }
   0x9   :  { %396 = shalt.err (!%p393_p4)  }
   0xa   :  { %s423_s13 = smov [#allocation3]  }
   0xb   :  { %10 = dma.vmem_to_smem %s8_s11, 16, %s423_s13, [#allocation2] }
   0xc   :  { %419 = dma.done.wait [#allocation2], 16 }
   0xd   :  { %420 = vsyncadd [#allocation2], 4294967280 }
   0xe   :  { %12 = sfence }
   0xf   :  { %s357_s14 = sld [smem:[#allocation3 + $0x9]]  ;;  %s353_s15 = sld [smem:[#allocation3 + $0x5]] }
  0x10   :  { %13 = vsyncpa [#allocation5], 0  ;;  %s354_s16 = sld [smem:[#allocation3 + $0x6]]  ;;  %s349_s17 = sld [smem:[#allocation3 + $0x1]]  ;;  %vm44_vm0 = vcmask 261120   ;;  %vm46_vm1 = vcmask 523264  }
  0x11   :  { %s355_s18 = sld [smem:[#allocation3 + $0x7]]  ;;  %s358_s0 = sld [smem:[#allocation3 + $0xa]]  ;;  %vm48_vm2 = vcmask 785408   ;;  %vm288_vm3 = vcmask 1040384   ;;  %vm290_vm4 = vcmask 1041408   ;;  %vm292_vm5 = vcmask 1042432  }
  0x12   :  { %s350_s22 = sld [smem:[#allocation3 + $0x2]]  ;;  %s361_s26 = sld [smem:[#allocation3 + $0xd]]  ;;  %vm294_vm6 = vcmask 1043456   ;;  %vm296_vm7 = vcmask 1044480   ;;  %vm298_vm8 = vcmask 1045504   ;;  %vm300_vm9 = vcmask 1046528  }
  0x13   :  { %s424_s27 = smov 32   ;;  %s362_s9 = sld [smem:[#allocation3 + $0xe]] }
  0x14   :  { %s359_s13 = sld [smem:[#allocation3 + $0xb]]  ;;  %s365_s23 = sld [smem:[#allocation3 + $0x11]] }
  0x15   :  { %s87_s21 = scalar_lea.vmem %s610_s1, %s357_s14  ;;  %s56_s25 = scalar_lea.vmem %s610_s1, %s353_s15 }
  0x16   :  { %v88_v0 = vld [vmem:[%s87_s21] sm:$0x1]  ;;  %s60_s30 = scalar_lea.vmem %s610_s1, %s354_s16  ;;  %s22_s5 = scalar_lea.vmem %s610_s1, %s349_s17 }
  0x17   :  { %98 = vrot.lane.b32.xlu1 %v88_v0, %s424_s27  ;;  %v57_v1 = vld [vmem:[%s56_s25] sm:$0x1]  ;;  %s91_s8 = scalar_lea.vmem %s610_s1, %s358_s0  ;;  %s64_s12 = scalar_lea.vmem %s610_s1, %s355_s18 }
  0x18   :  { %67 = vrot.lane.b32.xlu0 %v57_v1, %s424_s27  ;;  %v23_v2 = vld [vmem:[%s22_s5] sm:$0x1]  ;;  %s425_s14 = smov 64   ;;  %s26_s17 = scalar_lea.vmem %s610_s1, %s350_s22 }
  0x19   :  { %v61_v3 = vld [vmem:[%s60_s30] sm:$0x1]  ;;  %s351_s19 = sld [smem:[#allocation3 + $0x3]]  ;;  %s118_s21 = scalar_lea.vmem %s610_s1, %s361_s26 }
  0x1a   :  { %v92_v4 = vld [vmem:[%s91_s8] sm:$0x1]  ;;  %s426_s18 = smov 96   ;;  %s122_s28 = scalar_lea.vmem %s610_s1, %s362_s9 }
  0x1b   :  { %33 = vrot.lane.b32.xlu1 %v23_v2, %s424_s27  ;;  %v65_v5 = vld [vmem:[%s64_s12] sm:$0x1]  ;;  %s366_s29 = sld [smem:[#allocation3 + $0x12]]  ;;  %s95_s3 = scalar_lea.vmem %s610_s1, %s359_s13 }
  0x1c   :  { %71 = vrot.lane.b32.xlu0 %v61_v3, %s425_s14  ;;  %v27_v6 = vld [vmem:[%s26_s17] sm:$0x1]  ;;  %s363_s4 = sld [smem:[#allocation3 + $0xf]]  ;;  %s367_s7 = sld [smem:[#allocation3 + $0x13]] }
  0x1d   :  { %v119_v7 = vld [vmem:[%s118_s21] sm:$0x1]  ;;  %s149_s9 = scalar_lea.vmem %s610_s1, %s365_s23  ;;  %s369_s11 = sld [smem:[#allocation3 + $0x15]] }
  0x1e   :  { %v123_v8 = vld [vmem:[%s122_s28] sm:$0x1]  ;;  %s373_s16 = sld [smem:[#allocation3 + $0x19]]  ;;  %s370_s0 = sld [smem:[#allocation3 + $0x16]] }
  0x1f   :  { %102 = vrot.lane.b32.xlu1 %v92_v4, %s425_s14  ;;  %v96_v9 = vld [vmem:[%s95_s3] sm:$0x1]  ;;  %s30_s6 = scalar_lea.vmem %s610_s1, %s351_s19  ;;  %s374_s25 = sld [smem:[#allocation3 + $0x1a]] }
  0x20   :  { %75 = vrot.lane.b32.xlu0 %v65_v5, %s426_s18  ;;  %v31_v10 = vld [vmem:[%s30_s6] sm:$0x1]  ;;  %s371_s22 = sld [smem:[#allocation3 + $0x17]]  ;;  %s375_s5 = sld [smem:[#allocation3 + $0x1b]] }
  0x21   :  { %v150_v11 = vld [vmem:[%s149_s9] sm:$0x1]  ;;  %s153_s15 = scalar_lea.vmem %s610_s1, %s366_s29  ;;  %s377_s10 = sld [smem:[#allocation3 + $0x1d]] }
  0x22   :  { %s126_s19 = scalar_lea.vmem %s610_s1, %s363_s4  ;;  %v154_v12 = vld [vmem:[%s153_s15] sm:$0x1]  ;;  %s157_s24 = scalar_lea.vmem %s610_s1, %s367_s7 }
  0x23   :  { %37 = vrot.lane.b32.xlu1 %v27_v6, %s425_s14  ;;  %v127_v13 = vld [vmem:[%s126_s19] sm:$0x1]  ;;  %s180_s29 = scalar_lea.vmem %s610_s1, %s369_s11  ;;  %s379_s13 = sld [smem:[#allocation3 + $0x1f]] }
  0x24   :  { %129 = vrot.lane.b32.xlu0 %v119_v7, %s424_s27  ;;  %v158_v14 = vld [vmem:[%s157_s24] sm:$0x1]  ;;  %s211_s26 = scalar_lea.vmem %s610_s1, %s373_s16  ;;  %s184_s7 = scalar_lea.vmem %s610_s1, %s370_s0 }
  0x25   :  { %v181_v15 = vld [vmem:[%s180_s29] sm:$0x1]  ;;  %s215_s12 = scalar_lea.vmem %s610_s1, %s374_s25  ;;  %s378_s20 = sld [smem:[#allocation3 + $0x1e]] }
  0x26   :  { %v212_v16 = vld [vmem:[%s211_s26] sm:$0x1]  ;;  %s188_s16 = scalar_lea.vmem %s610_s1, %s371_s22  ;;  %s219_s21 = scalar_lea.vmem %s610_s1, %s375_s5 }
  0x27   :  { %133 = vrot.lane.b32.xlu1 %v123_v8, %s425_s14  ;;  %v185_v17 = vld [vmem:[%s184_s7] sm:$0x1]  ;;  %s242_s25 = scalar_lea.vmem %s610_s1, %s377_s10  ;;  %s352_s26 = sld [smem:[#allocation3 + $0x4]] }
  0x28   :  { %106 = vrot.lane.b32.xlu0 %v96_v9, %s426_s18  ;;  %v216_v18 = vld [vmem:[%s215_s12] sm:$0x1]  ;;  %s17_s5 = sld [smem:[#allocation3]]  ;;  %s360_s6 = sld [smem:[#allocation3 + $0xc]] }
  0x29   :  { %v189_v19 = vld [vmem:[%s188_s16] sm:$0x1]  ;;  %s250_s29 = scalar_lea.vmem %s610_s1, %s379_s13  ;;  %s364_s8 = sld [smem:[#allocation3 + $0x10]] }
  0x2a   :  { %v220_v20 = vld [vmem:[%s219_s21] sm:$0x1]  ;;  %s550_s15 = sld [smem:[#allocation3 + $0x1c]] }
  0x2b   :  { %41 = vrot.lane.b32.xlu1 %v31_v10, %s426_s18  ;;  %v243_v21 = vld [vmem:[%s242_s25] sm:$0x1]  ;;  %s246_s4 = scalar_lea.vmem %s610_s1, %s378_s20 }
  0x2c   :  { %160 = vrot.lane.b32.xlu0 %v150_v11, %s424_s27  ;;  %v251_v22 = vld [vmem:[%s250_s29] sm:$0x1] }
  0x2d   :  { %v247_v23 = vld [vmem:[%s246_s4] sm:$0x1]  ;;  %s52_s9 = scalar_lea.vmem %s610_s1, %s352_s26 }
  0x2e   :  { %v53_v40 = vld [vmem:[%s52_s9] sm:$0x1]  ;;  %s18_s20 = scalar_lea.vmem %s610_s1, %s17_s5  ;;  %s114_s21 = scalar_lea.vmem %s610_s1, %s360_s6 }
  0x2f   :  { %164 = vrot.lane.b32.xlu1 %v154_v12, %s425_s14  ;;  %s145_s25 = scalar_lea.vmem %s610_s1, %s364_s8  ;;  %v19_v46 = vld [vmem:[%s18_s20] sm:$0x1] }
  0x30   :  { %137 = vrot.lane.b32.xlu0 %v127_v13, %s426_s18  ;;  %v115_v47 = vld [vmem:[%s114_s21] sm:$0x1]  ;;  %s238_s5 = scalar_lea.vmem %s610_s1, %s550_s15 }
  0x31   :  { %v146_v49 = vld [vmem:[%s145_s25] sm:$0x1] }
  0x32   :  { %v239_v12 = vld [vmem:[%s238_s5] sm:$0x1] }
  0x33   :  { %168 = vrot.lane.b32.xlu1 %v158_v14, %s426_s18 }
  0x34   :  { %191 = vrot.lane.b32.xlu0 %v181_v15, %s424_s27 }
  0x37   :  { %222 = vrot.lane.b32.xlu1 %v212_v16, %s424_s27 }
  0x38   :  { %195 = vrot.lane.b32.xlu0 %v185_v17, %s425_s14 }
  0x3b   :  { %226 = vrot.lane.b32.xlu1 %v216_v18, %s425_s14 }
  0x3c   :  { %199 = vrot.lane.b32.xlu0 %v189_v19, %s426_s18 }
  0x3f   :  { %230 = vrot.lane.b32.xlu1 %v220_v20, %s426_s18 }
  0x40   :  { %253 = vrot.lane.b32.xlu0 %v243_v21, %s424_s27  ;;  %s356_s27 = sld [smem:[#allocation3 + $0x8]] }
  0x43   :  { %261 = vrot.lane.b32.xlu1 %v251_v22, %s426_s18  ;;  %s542_s18 = sld [smem:[#allocation3 + $0x18]] }
  0x44   :  { %257 = vrot.lane.b32.xlu0 %v247_v23, %s425_s14  ;;  %s368_s14 = sld [smem:[#allocation3 + $0x14]] }
  0x46   :  { %s83_s13 = scalar_lea.vmem %s610_s1, %s356_s27 }
  0x47   :  { %v84_v42 = vld [vmem:[%s83_s13] sm:$0x1] }
  0x49   :  { %s207_s4 = scalar_lea.vmem %s610_s1, %s542_s18 }
  0x4a   :  { %s176_s29 = scalar_lea.vmem %s610_s1, %s368_s14  ;;  %v208_v56 = vld [vmem:[%s207_s4] sm:$0x1]  ;;  %s427_s1 = smov [#allocation4]  }
  0x4b   :  { %v177_v51 = vld [vmem:[%s176_s29] sm:$0x1]  ;;  %s309_s6 = sshll.u32 %s427_s1, 4  ;;  %s310_s6 = int_to_ptr.vmem [resolvable:$true] %s309_s6 }
  0x4c   :  { %s397_s8 = scalar_lea.vmem %s310_s6, 128  ;;  %p402_p6 = scmp.lt.s32.totalorder %s310_s6, %s310_s6 }
  0x4d   :  { %p398_p5 = scmp.ne.s32.totalorder %s310_s6, %s397_s8  ;;  %p403_p7 = scmp.lt.s32.totalorder %s397_s8, %s397_s8 }
  0x4f   :  { %p404_p8 = por %p403_p7, %p402_p6 }
  0x51   :  { %p405_p9 = pnand %p404_p8, %p398_p5 }
  0x89   :  { %v99_v24 = vpop.permute.xlu1 %98 }
  0x8a   :  { %v68_v25 = vpop.permute.xlu0 %67  ;;  %v109_v50 = vsel %vm44_vm0, %v84_v42, %v99_v24 }
  0x8b   :  { %v78_v43 = vsel %vm44_vm0, %v53_v40, %v68_v25 }
  0x8d   :  { %v34_v26 = vpop.permute.xlu1 %33 }
  0x8e   :  { %v72_v27 = vpop.permute.xlu0 %71  ;;  %v45_v53 = vsel %vm44_vm0, %v19_v46, %v34_v26 }
  0x8f   :  { %v79_v45 = vsel %vm46_vm1, %v78_v43, %v72_v27 }
  0x91   :  { %v103_v28 = vpop.permute.xlu1 %102 }
  0x92   :  { %v76_v29 = vpop.permute.xlu0 %75  ;;  %v110_v54 = vsel %vm46_vm1, %v109_v50, %v103_v28 }
  0x93   :  { %v80_v48 = vsel %vm48_vm2, %v79_v45, %v76_v29 }
  0x94   :  { %v268_v58 = vrot.slane %v80_v48, 7 }
  0x95   :  { %v38_v30 = vpop.permute.xlu1 %37 }
  0x96   :  { %v130_v31 = vpop.permute.xlu0 %129  ;;  %v47_v59 = vsel %vm46_vm1, %v45_v53, %v38_v30 }
  0x97   :  { %v140_v55 = vsel %vm44_vm0, %v115_v47, %v130_v31 }
  0x99   :  { %v134_v32 = vpop.permute.xlu1 %133 }
  0x9a   :  { %v107_v33 = vpop.permute.xlu0 %106  ;;  %v141_v60 = vsel %vm46_vm1, %v140_v55, %v134_v32 }
  0x9b   :  { %v111_v2 = vsel %vm48_vm2, %v110_v54, %v107_v33 }
  0x9c   :  { %v271_v14 = vrot.slane %v111_v2, 6 }
  0x9d   :  { %v42_v34 = vpop.permute.xlu1 %41 }
  0x9e   :  { %v161_v35 = vpop.permute.xlu0 %160  ;;  %v49_v62 = vsel %vm48_vm2, %v47_v59, %v42_v34 }
  0x9f   :  { %v171_v61 = vsel %vm44_vm0, %v146_v49, %v161_v35  ;;  %v289_v10 = vsel %vm288_vm3, %v49_v62, %v268_v58 }
  0xa0   :  { %v291_v18 = vsel %vm290_vm4, %v289_v10, %v271_v14 }
  0xa1   :  { %v165_v36 = vpop.permute.xlu1 %164 }
  0xa2   :  { %v138_v37 = vpop.permute.xlu0 %137  ;;  %v172_v0 = vsel %vm46_vm1, %v171_v61, %v165_v36 }
  0xa3   :  { %v142_v63 = vsel %vm48_vm2, %v141_v60, %v138_v37 }
  0xa4   :  { %v274_v11 = vrot.slane %v142_v63, 5 }
  0xa5   :  { %v169_v38 = vpop.permute.xlu1 %168 }
  0xa6   :  { %v192_v39 = vpop.permute.xlu0 %191  ;;  %v173_v3 = vsel %vm48_vm2, %v172_v0, %v169_v38  ;;  %v293_v22 = vsel %vm292_vm5, %v291_v18, %v274_v11 }
  0xa7   :  { %v202_v1 = vsel %vm44_vm0, %v177_v51, %v192_v39  ;;  %v277_v15 = vrot.slane %v173_v3, 4 }
  0xa9   :  { %v223_v41 = vpop.permute.xlu1 %222  ;;  %v295_v24 = vsel %vm294_vm6, %v293_v22, %v277_v15 }
  0xaa   :  { %v196_v44 = vpop.permute.xlu0 %195  ;;  %v233_v5 = vsel %vm44_vm0, %v208_v56, %v223_v41 }
  0xab   :  { %v203_v4 = vsel %vm46_vm1, %v202_v1, %v196_v44 }
  0xad   :  { %v227_v52 = vpop.permute.xlu1 %226 }
  0xae   :  { %v200_v57 = vpop.permute.xlu0 %199  ;;  %v234_v8 = vsel %vm46_vm1, %v233_v5, %v227_v52 }
  0xaf   :  { %v204_v7 = vsel %vm48_vm2, %v203_v4, %v200_v57 }
  0xb0   :  { %v280_v16 = vrot.slane %v204_v7, 3 }
  0xb1   :  { %v231_v6 = vpop.permute.xlu1 %230 }
  0xb2   :  { %v254_v9 = vpop.permute.xlu0 %253  ;;  %v235_v13 = vsel %vm48_vm2, %v234_v8, %v231_v6  ;;  %v297_v27 = vsel %vm296_vm7, %v295_v24, %v280_v16 }
  0xb3   :  { %v264_v19 = vsel %vm44_vm0, %v239_v12, %v254_v9  ;;  %v283_v20 = vrot.slane %v235_v13, 2 }
  0xb5   :  { %v262_v17 = vpop.permute.xlu1 %261  ;;  %v299_v28 = vsel %vm298_vm8, %v297_v27, %v283_v20 }
  0xb6   :  { %v258_v21 = vpop.permute.xlu0 %257 }
  0xb7   :  { %v265_v23 = vsel %vm46_vm1, %v264_v19, %v258_v21 }
  0xb8   :  { %v266_v25 = vsel %vm48_vm2, %v265_v23, %v262_v17 }
  0xb9   :  { %v286_v26 = vrot.slane %v266_v25, 1 }
  0xbb   :  { %v301_v29 = vsel %vm300_vm9, %v299_v28, %v286_v26 }
  0xbc   :  { %302 = vst [vmem:[#allocation4] sm:$0xff] %v301_v29 }
  0xbd   :  { %408 = shalt.err (!%p405_p9)
}
  0xbe   :  { %s409_s7 = scalar_lea.hbm %s611_s2, 128 }
  0xbf   :  { %p410_p10 = scmp.ne.s32.totalorder %s611_s2, %s409_s7  ;;  %p413_p11 = scmp.lt.u32.totalorder %s409_s7, %s611_s2 }
  0xc1   :  { %p415_p12 = pnand %p413_p11, %p410_p10 }
  0xc3   :  { %418 = shalt.err (!%p415_p12)
}
  0xc4   :  { %312 = dma.vmem_to_hbm [thread:$0]  %s310_s6, 128, %s611_s2, [#allocation5]  }
  0xc5   :  { %421 = dma.done.wait [#allocation5], 128  }
  0xc6   :  { %422 = vsyncadd [#allocation5], 4294967168 }
  0xc7   :  { %316 = vsyncpa [#allocation5], 1 }

</bundles_post_ra>
